<compile_context>
chip_gen: v5e
topology: v5e:2x2
jax: 0.10.0
libtpu: 0.0.40
codegen_flags: <defaults>
</compile_context>

<pallas_src>
import functools

import jax
import jax.numpy as jnp
from jax.experimental import pallas as pl
from jax.experimental.pallas import tpu as pltpu


def _round_up(x, m):
    return (x + m - 1) // m * m


def _mxu_lane_align():
    """MXU-friendly feature alignment: 256 on v6e/v7x (256x256 MXU), 128 on v2-v5."""
    try:
        kind = jax.devices()[0].device_kind.lower()
    except Exception:
        return 128
    for tag in ("v2", "v3", "v4", "v5"):
        if tag in kind:
            return 128
    return 256


def _vmem_cap_bytes():
    """Per-chip cap for vmem_limit_bytes (~0.8x VMEM capacity)."""
    try:
        cap = int(pltpu.get_tpu_info().vmem_capacity_bytes)
    except Exception:
        cap = 64 * 1024 * 1024  # conservative fallback (v7x per-TC VMEM)
    return int(0.8 * cap)


def _feat_pad(n, align):
    """Pad a feature dim to a lane multiple; use full MXU width only when n > 128."""
    p = _round_up(n, 128)
    if align > 128 and p > 128:
        p = _round_up(n, align)
    return p


def _mlp_kernel(x_ref,
                w1_ref, b1_ref,
                w2_ref, b2_ref,
                w3_ref, b3_ref,
                w4_ref, b4_ref,
                o_ref):
    cd = w1_ref.dtype  # matmul input dtype (bf16 or f32); accumulation is always f32
    # Layer 1: Linear(input_dim -> hidden) + ReLU   (Dropout = identity, eval)
    h = jnp.dot(x_ref[...].astype(cd), w1_ref[...], preferred_element_type=jnp.float32)
    h = jnp.maximum(h + b1_ref[...], 0.0)
    # Layer 2: Linear(hidden -> hidden) + ReLU
    h = jnp.dot(h.astype(cd), w2_ref[...], preferred_element_type=jnp.float32)
    h = jnp.maximum(h + b2_ref[...], 0.0)
    # Layer 3: Linear(hidden -> hidden) + ReLU
    h = jnp.dot(h.astype(cd), w3_ref[...], preferred_element_type=jnp.float32)
    h = jnp.maximum(h + b3_ref[...], 0.0)
    # Layer 4: Linear(hidden -> output_dim), no activation
    out = jnp.dot(h.astype(cd), w4_ref[...], preferred_element_type=jnp.float32)
    o_ref[...] = (out + b4_ref[...]).astype(o_ref.dtype)
    # TODO(synk): training-mode Dropout (pltpu.prng_random_bits mask) not emitted;
    #             this forward matches PyTorch eval() semantics.


def prepare_generator2_params(params, *, use_bf16=True):
    """One-time / offline weight prep. Call once and reuse the result.

    Zero-pads the hidden dim to an MXU-friendly lane multiple (padding is exact:
    ReLU(0)=0 in padded columns, zero rows contribute 0 downstream) and optionally
    casts weights to bf16 (biases stay f32; accumulation in-kernel is f32).
    """
    w1, b1 = params["w1"], params["b1"]
    w2, b2 = params["w2"], params["b2"]
    w3, b3 = params["w3"], params["b3"]
    w4, b4 = params["w4"], params["b4"]
    hidden = w1.shape[1]
    d_out = w4.shape[1]
    hid_p = _feat_pad(hidden, _mxu_lane_align())
    ph = hid_p - hidden
    wd = jnp.bfloat16 if use_bf16 else jnp.float32

    return dict(
        w1=jnp.pad(w1, ((0, 0), (0, ph))).astype(wd),
        b1=jnp.pad(b1, (0, ph)).reshape(1, hid_p).astype(jnp.float32),
        w2=jnp.pad(w2, ((0, ph), (0, ph))).astype(wd),
        b2=jnp.pad(b2, (0, ph)).reshape(1, hid_p).astype(jnp.float32),
        w3=jnp.pad(w3, ((0, ph), (0, ph))).astype(wd),
        b3=jnp.pad(b3, (0, ph)).reshape(1, hid_p).astype(jnp.float32),
        w4=jnp.pad(w4, ((0, ph), (0, 0))).astype(wd),
        b4=b4.reshape(1, d_out).astype(jnp.float32),
    )


@functools.partial(jax.jit, static_argnames=("tm",))
def generator2_forward(x, padded, *, tm=256):
    """x: (B, input_dim) float32. padded: output of prepare_generator2_params.

    tm: max batch tile (sweep 256..1024 for large batches); it is clamped /
    split so there are at least 2 grid steps whenever the batch allows it.
    """
    w1, b1 = padded["w1"], padded["b1"]
    w2, b2 = padded["w2"], padded["b2"]
    w3, b3 = padded["w3"], padded["b3"]
    w4, b4 = padded["w4"], padded["b4"]

    B, d_in = x.shape
    hid_p = w1.shape[1]
    d_out = w4.shape[1]
    assert w1.shape[0] == d_in

    SUB = 8  # f32 sublane multiple
    B8 = _round_up(B, SUB)

    # --- Batch tiling: big tile, but guarantee >= 2 grid steps when possible
    # (megacore sharding on v7x; DMA/compute/writeback overlap everywhere).
    tm_eff = _round_up(max(SUB, min(tm, B8)), SUB)
    if B8 >= 2 * SUB and pl.cdiv(B8, tm_eff) < 2:
        tm_eff = _round_up(pl.cdiv(B8, 2), SUB)
    n_tiles = pl.cdiv(B, tm_eff)
    Bp = n_tiles * tm_eff
    # Only the ragged tail is padded (and only when needed).
    x_in = jnp.pad(x, ((0, Bp - B), (0, 0))) if Bp != B else x

    # --- VMEM budget: per-chip cap, weights counted single-buffered.
    wbytes = jnp.dtype(w1.dtype).itemsize
    est = (2 * tm_eff * d_in * 4                                         # x tile (x2 buf)
           + 2 * tm_eff * d_out * 4                                      # out tile (x2 buf)
           + (d_in * hid_p + 2 * hid_p * hid_p + hid_p * d_out) * wbytes # weights (x1 buf)
           + (3 * hid_p + d_out) * 4                                     # biases (x1 buf)
           + 4 * tm_eff * hid_p * 4)                                     # live intermediates
    vmem_limit = int(min(max(2 * est, 32 * 1024 * 1024), _vmem_cap_bytes()))

    # Grid-invariant weights/biases: single-buffer them (they never change across
    # the grid; default double-buffering just wastes VMEM).
    def w_spec(shape):
        return pl.BlockSpec(shape, lambda i: (0, 0), pipeline_mode=pl.Buffered(1))

    out = pl.pallas_call(
        _mlp_kernel,
        out_shape=jax.ShapeDtypeStruct((Bp, d_out), x.dtype),
        grid_spec=pltpu.PrefetchScalarGridSpec(
            num_scalar_prefetch=0,
            grid=(n_tiles,),
            in_specs=[
                pl.BlockSpec((tm_eff, d_in), lambda i: (i, 0)),   # x tile
                w_spec((d_in, hid_p)), w_spec((1, hid_p)),        # w1, b1
                w_spec((hid_p, hid_p)), w_spec((1, hid_p)),       # w2, b2
                w_spec((hid_p, hid_p)), w_spec((1, hid_p)),       # w3, b3
                w_spec((hid_p, d_out)), w_spec((1, d_out)),       # w4, b4
            ],
            # Output is written at its true width (Bp, d_out): legal because the
            # block's last dim equals the full array dim; avoids 8-16x inflated
            # output HBM traffic from lane padding + a trailing re-slice.
            out_specs=pl.BlockSpec((tm_eff, d_out), lambda i: (i, 0)),
        ),
        compiler_params=pltpu.CompilerParams(
            dimension_semantics=("parallel",),
            vmem_limit_bytes=vmem_limit,
        ),
    )(x_in, w1, b1, w2, b2, w3, b3, w4, b4)

    # NOTE: if profiling shows exposed x/out DMA for very short per-step compute,
    # bump those two BlockSpecs to pipeline_mode=pl.Buffered(3).
    return out[:B] if Bp != B else out


def init_generator2_params(key, input_dim, hidden_dim, output_dim):
    """Deterministic init mimicking nn.Linear default (uniform +-1/sqrt(fan_in))."""
    def linear(k, fan_in, fan_out):
        kw, kb = jax.random.split(k)
        bound = 1.0 / jnp.sqrt(fan_in)
        w = jax.random.uniform(kw, (fan_in, fan_out), jnp.float32, -bound, bound)
        b = jax.random.uniform(kb, (fan_out,), jnp.float32, -bound, bound)
        return w, b

    k1, k2, k3, k4 = jax.random.split(key, 4)
    w1, b1 = linear(k1, input_dim, hidden_dim)
    w2, b2 = linear(k2, hidden_dim, hidden_dim)
    w3, b3 = linear(k3, hidden_dim, hidden_dim)
    w4, b4 = linear(k4, hidden_dim, output_dim)
    return dict(w1=w1, b1=b1, w2=w2, b2=b2, w3=w3, b3=b3, w4=w4, b4=b4)


def _reference_forward(x, p):
    h = jnp.maximum(x @ p["w1"] + p["b1"], 0.0)
    h = jnp.maximum(h @ p["w2"] + p["b2"], 0.0)
    h = jnp.maximum(h @ p["w3"] + p["b3"], 0.0)
    return h @ p["w4"] + p["b4"]


if __name__ == "__main__":
    key = jax.random.PRNGKey(0)
    k_param, k_x = jax.random.split(key)

    # Small shapes; batch is a non-multiple of the tile to exercise the ragged path.
    batch, input_dim, hidden_dim, output_dim = 130, 32, 32, 16
    params = init_generator2_params(k_param, input_dim, hidden_dim, output_dim)
    x = jax.random.normal(k_x, (batch, input_dim), dtype=jnp.float32)

    y_ref = _reference_forward(x, params)

    # f32 path (bit-exact parity with the f32 reference); tm=64 exercises the
    # multi-tile + ragged-tail path.
    p_f32 = prepare_generator2_params(params, use_bf16=False)
    y32 = jax.block_until_ready(generator2_forward(x, p_f32, tm=64))
    assert y32.shape == (batch, output_dim)
    assert jnp.allclose(y32, y_ref, atol=1e-5, rtol=1e-5)

    # Default bf16-input / f32-accumulate path (throughput path); default tm
    # exercises the forced >=2-tile split.
    p_bf16 = prepare_generator2_params(params, use_bf16=True)
    y16 = jax.block_until_ready(generator2_forward(x, p_bf16))
    assert y16.shape == (batch, output_dim)
    assert jnp.allclose(y16, y_ref, atol=5e-2, rtol=5e-2)

    print("KERNEL_OK")
</pallas_src>

<mosaic_0001>
module attributes {stable_mosaic.version = 11 : i64} {
  func.func @_mlp_kernel(%arg0: i32, %arg1: memref<64x32xf32, #tpu.memory_space<vmem>>, %arg2: memref<32x128xf32, #tpu.memory_space<vmem>>, %arg3: memref<1x128xf32, #tpu.memory_space<vmem>>, %arg4: memref<128x128xf32, #tpu.memory_space<vmem>>, %arg5: memref<1x128xf32, #tpu.memory_space<vmem>>, %arg6: memref<128x128xf32, #tpu.memory_space<vmem>>, %arg7: memref<1x128xf32, #tpu.memory_space<vmem>>, %arg8: memref<128x16xf32, #tpu.memory_space<vmem>>, %arg9: memref<1x16xf32, #tpu.memory_space<vmem>>, %arg10: memref<64x16xf32, #tpu.memory_space<vmem>>) attributes {dimension_semantics = [#tpu.dimension_semantics<parallel>], iteration_bounds = array<i64: 3>, scalar_prefetch = 0 : i64, scratch_operands = 0 : i64, tpu.core_type = #tpu.core_type<tc>, window_params = [{transform_indices = @transform_0, window_bounds = array<i64: 64, 32>}, {pipeline_mode = #tpu.pipeline_mode<synchronous>, transform_indices = @transform_1, window_bounds = array<i64: 32, 128>}, {pipeline_mode = #tpu.pipeline_mode<synchronous>, transform_indices = @transform_2, window_bounds = array<i64: 1, 128>}, {pipeline_mode = #tpu.pipeline_mode<synchronous>, transform_indices = @transform_3, window_bounds = array<i64: 128, 128>}, {pipeline_mode = #tpu.pipeline_mode<synchronous>, transform_indices = @transform_4, window_bounds = array<i64: 1, 128>}, {pipeline_mode = #tpu.pipeline_mode<synchronous>, transform_indices = @transform_5, window_bounds = array<i64: 128, 128>}, {pipeline_mode = #tpu.pipeline_mode<synchronous>, transform_indices = @transform_6, window_bounds = array<i64: 1, 128>}, {pipeline_mode = #tpu.pipeline_mode<synchronous>, transform_indices = @transform_7, window_bounds = array<i64: 128, 16>}, {pipeline_mode = #tpu.pipeline_mode<synchronous>, transform_indices = @transform_8, window_bounds = array<i64: 1, 16>}, {transform_indices = @transform_9, window_bounds = array<i64: 64, 16>}]} {
    %c0 = arith.constant 0 : index
    %c0_0 = arith.constant 0 : index
    %0 = vector.load %arg1[%c0, %c0_0] : memref<64x32xf32, #tpu.memory_space<vmem>>, vector<64x32xf32>
    %c0_1 = arith.constant 0 : index
    %c0_2 = arith.constant 0 : index
    %1 = vector.load %arg2[%c0_1, %c0_2] : memref<32x128xf32, #tpu.memory_space<vmem>>, vector<32x128xf32>
    %cst = arith.constant dense<0.000000e+00> : vector<64x128xf32>
    %2 = tpu.matmul %0, %1, %cst {dimension_numbers = #tpu.dot_dimension_numbers<[1], [0], [0], [1], [0, 0, 1, 1], [], []>} : vector<64x32xf32>, vector<32x128xf32>, vector<64x128xf32> -> vector<64x128xf32>
    %c0_3 = arith.constant 0 : index
    %c0_4 = arith.constant 0 : index
    %3 = vector.load %arg3[%c0_3, %c0_4] : memref<1x128xf32, #tpu.memory_space<vmem>>, vector<1x128xf32>
    %4 = vector.broadcast %3 : vector<1x128xf32> to vector<64x128xf32>
    %5 = arith.addf %2, %4 : vector<64x128xf32>
    %cst_5 = arith.constant 0.000000e+00 : f32
    %6 = vector.broadcast %cst_5 : f32 to vector<64x128xf32>
    %7 = arith.maximumf %5, %6 : vector<64x128xf32>
    %c0_6 = arith.constant 0 : index
    %c0_7 = arith.constant 0 : index
    %8 = vector.load %arg4[%c0_6, %c0_7] : memref<128x128xf32, #tpu.memory_space<vmem>>, vector<128x128xf32>
    %cst_8 = arith.constant dense<0.000000e+00> : vector<64x128xf32>
    %9 = tpu.matmul %7, %8, %cst_8 {dimension_numbers = #tpu.dot_dimension_numbers<[1], [0], [0], [1], [0, 0, 1, 1], [], []>} : vector<64x128xf32>, vector<128x128xf32>, vector<64x128xf32> -> vector<64x128xf32>
    %c0_9 = arith.constant 0 : index
    %c0_10 = arith.constant 0 : index
    %10 = vector.load %arg5[%c0_9, %c0_10] : memref<1x128xf32, #tpu.memory_space<vmem>>, vector<1x128xf32>
    %11 = vector.broadcast %10 : vector<1x128xf32> to vector<64x128xf32>
    %12 = arith.addf %9, %11 : vector<64x128xf32>
    %cst_11 = arith.constant 0.000000e+00 : f32
    %13 = vector.broadcast %cst_11 : f32 to vector<64x128xf32>
    %14 = arith.maximumf %12, %13 : vector<64x128xf32>
    %c0_12 = arith.constant 0 : index
    %c0_13 = arith.constant 0 : index
    %15 = vector.load %arg6[%c0_12, %c0_13] : memref<128x128xf32, #tpu.memory_space<vmem>>, vector<128x128xf32>
    %cst_14 = arith.constant dense<0.000000e+00> : vector<64x128xf32>
    %16 = tpu.matmul %14, %15, %cst_14 {dimension_numbers = #tpu.dot_dimension_numbers<[1], [0], [0], [1], [0, 0, 1, 1], [], []>} : vector<64x128xf32>, vector<128x128xf32>, vector<64x128xf32> -> vector<64x128xf32>
    %c0_15 = arith.constant 0 : index
    %c0_16 = arith.constant 0 : index
    %17 = vector.load %arg7[%c0_15, %c0_16] : memref<1x128xf32, #tpu.memory_space<vmem>>, vector<1x128xf32>
    %18 = vector.broadcast %17 : vector<1x128xf32> to vector<64x128xf32>
    %19 = arith.addf %16, %18 : vector<64x128xf32>
    %cst_17 = arith.constant 0.000000e+00 : f32
    %20 = vector.broadcast %cst_17 : f32 to vector<64x128xf32>
    %21 = arith.maximumf %19, %20 : vector<64x128xf32>
    %c0_18 = arith.constant 0 : index
    %c0_19 = arith.constant 0 : index
    %22 = vector.load %arg8[%c0_18, %c0_19] : memref<128x16xf32, #tpu.memory_space<vmem>>, vector<128x16xf32>
    %cst_20 = arith.constant dense<0.000000e+00> : vector<64x16xf32>
    %23 = tpu.matmul %21, %22, %cst_20 {dimension_numbers = #tpu.dot_dimension_numbers<[1], [0], [0], [1], [0, 0, 1, 1], [], []>} : vector<64x128xf32>, vector<128x16xf32>, vector<64x16xf32> -> vector<64x16xf32>
    %c0_21 = arith.constant 0 : index
    %c0_22 = arith.constant 0 : index
    %24 = vector.load %arg9[%c0_21, %c0_22] : memref<1x16xf32, #tpu.memory_space<vmem>>, vector<1x16xf32>
    %25 = vector.broadcast %24 : vector<1x16xf32> to vector<64x16xf32>
    %26 = arith.addf %23, %25 : vector<64x16xf32>
    %c0_23 = arith.constant 0 : index
    %c0_24 = arith.constant 0 : index
    %27 = vector.load %arg10[%c0_23, %c0_24] : memref<64x16xf32, #tpu.memory_space<vmem>>, vector<64x16xf32>
    tpu.vector_store %arg10[%c0_23, %c0_24], %26 {strides = array<i32>} : memref<64x16xf32, #tpu.memory_space<vmem>>, vector<64x16xf32>,
    return
  }
  func.func @transform_0(%arg0: i32) -> (i32, i32) {
    %c0_i32 = arith.constant 0 : i32
    %c0_i32_0 = arith.constant 0 : i32
    return %arg0, %c0_i32 : i32, i32
  }
  func.func @transform_1(%arg0: i32) -> (i32, i32) {
    %c0_i32 = arith.constant 0 : i32
    %c0_i32_0 = arith.constant 0 : i32
    %c0_i32_1 = arith.constant 0 : i32
    return %c0_i32, %c0_i32_0 : i32, i32
  }
  func.func @transform_2(%arg0: i32) -> (i32, i32) {
    %c0_i32 = arith.constant 0 : i32
    %c0_i32_0 = arith.constant 0 : i32
    %c0_i32_1 = arith.constant 0 : i32
    return %c0_i32, %c0_i32_0 : i32, i32
  }
  func.func @transform_3(%arg0: i32) -> (i32, i32) {
    %c0_i32 = arith.constant 0 : i32
    %c0_i32_0 = arith.constant 0 : i32
    %c0_i32_1 = arith.constant 0 : i32
    return %c0_i32, %c0_i32_0 : i32, i32
  }
  func.func @transform_4(%arg0: i32) -> (i32, i32) {
    %c0_i32 = arith.constant 0 : i32
    %c0_i32_0 = arith.constant 0 : i32
    %c0_i32_1 = arith.constant 0 : i32
    return %c0_i32, %c0_i32_0 : i32, i32
  }
  func.func @transform_5(%arg0: i32) -> (i32, i32) {
    %c0_i32 = arith.constant 0 : i32
    %c0_i32_0 = arith.constant 0 : i32
    %c0_i32_1 = arith.constant 0 : i32
    return %c0_i32, %c0_i32_0 : i32, i32
  }
  func.func @transform_6(%arg0: i32) -> (i32, i32) {
    %c0_i32 = arith.constant 0 : i32
    %c0_i32_0 = arith.constant 0 : i32
    %c0_i32_1 = arith.constant 0 : i32
    return %c0_i32, %c0_i32_0 : i32, i32
  }
  func.func @transform_7(%arg0: i32) -> (i32, i32) {
    %c0_i32 = arith.constant 0 : i32
    %c0_i32_0 = arith.constant 0 : i32
    %c0_i32_1 = arith.constant 0 : i32
    return %c0_i32, %c0_i32_0 : i32, i32
  }
  func.func @transform_8(%arg0: i32) -> (i32, i32) {
    %c0_i32 = arith.constant 0 : i32
    %c0_i32_0 = arith.constant 0 : i32
    %c0_i32_1 = arith.constant 0 : i32
    return %c0_i32, %c0_i32_0 : i32, i32
  }
  func.func @transform_9(%arg0: i32) -> (i32, i32) {
    %c0_i32 = arith.constant 0 : i32
    %c0_i32_0 = arith.constant 0 : i32
    return %arg0, %c0_i32 : i32, i32
  }
}

</mosaic_0001>

<bundles_post_ra>
// kernel: generator2_forward.1
= control target key start
LH: loop header
LB: loop body
LE: loop exit
PB: predicated region body
PF: predicated region fallthrough
CT: control target
= control target key end

     0   :  { %s779_s30 = smov 0   ;;  %s997_s0 = inlined_call_operand.vmem [shape: f32[192,32], index: 0, kind: input, shape index: {}]   ;;  %s998_s1 = inlined_call_operand.vmem [shape: f32[32,128], index: 1, kind: input, shape index: {}]   ;;  %s999_s2 = inlined_call_operand.vmem [shape: f32[1,128], index: 2, kind: input, shape index: {}]   ;;  %s1000_s3 = inlined_call_operand.vmem [shape: f32[128,128], index: 3, kind: input, shape index: {}]   ;;  %s1001_s4 = inlined_call_operand.vmem [shape: f32[1,128], index: 4, kind: input, shape index: {}]   ;;  %s1002_s5 = inlined_call_operand.vmem [shape: f32[128,128], index: 5, kind: input, shape index: {}]   ;;  %s1003_s6 = inlined_call_operand.vmem [shape: f32[1,128], index: 6, kind: input, shape index: {}]   ;;  %s1004_s7 = inlined_call_operand.vmem [shape: f32[128,16], index: 7, kind: input, shape index: {}]   ;;  %s1005_s8 = inlined_call_operand.vmem [shape: f32[1,16], index: 8, kind: input, shape index: {}]   ;;  %s1006_s9 = inlined_call_operand.vmem [shape: f32[192,16], index: 9, kind: output, shape index: {}]  }
   0x1 LB: > { %s690_s10 = sadd.s32 4294967295, %s727_s30   ;;  %p694_p0 = scmp.ge.s32.totalorder %s727_s30, 1  ;;  %s727_s30 = sphi %s779_s30, %s19_s30  }
   0x2   : > { %p288_p1 = scmp.lt.s32.totalorder %s727_s30, 4 }
   0x4   : > { %p289_p2 = pnand %p694_p0, %p288_p1 }
   0x5   : > { %s695_s15 = sshll.u32 (!%p289_p2), %s690_s10, 3 }
   0x6   : > { %292 = sbr.rel (%p289_p2) target bundleno = 606 (0x25e), region = 56  ;;  %p325_p3 = scmp.lt.s32.totalorder (!%p289_p2), %s695_s15, 23 }
   0xb   : > { %v347_v0 = vld [vmem:[%s998_s1 + $0x18] sm:$0xff]  ;;  %v346_v1 = vld [vmem:[%s998_s1 + $0x10] sm:$0xff]  ;;  %v345_v2 = vld [vmem:[%s998_s1 + $0x8] sm:$0xff]  ;;  %s1008_s15 = smov (!%p325_p3, %s695_s15), 23  ;;  %vm352_vm0 = vcmask 261120   ;;  %vm625_vm1 = vcmask 130048  }
   0xc   : > { %389 = vmatpush.msra.mxu0 %v347_v0  ;;  %v344_v3 = vld [vmem:[%s998_s1] sm:$0xff]  ;;  %s696_s20 = sshll.u32 %s1008_s15, 3  ;;  %v441_v8 = vld [vmem:[%s1000_s3 + $0x78] sm:$0xff]  ;;  %v440_v9 = vld [vmem:[%s1000_s3 + $0x70] sm:$0xff] }
   0xd   : > { %s807_s23 = scalar_lea.vmem %s997_s0, %s696_s20  ;;  %446 = vmatpush.msra.mxu1 %v441_v8  ;;  %v439_v10 = vld [vmem:[%s1000_s3 + $0x68] sm:$0xff]  ;;  %v438_v11 = vld [vmem:[%s1000_s3 + $0x60] sm:$0xff]  ;;  %v437_v13 = vld [vmem:[%s1000_s3 + $0x58] sm:$0xff] }
   0xe   : > { %390 = vmatpush.msra.mxu0 %v346_v1  ;;  %v336_v4 = vld [vmem:[%s807_s23] sm:$0xff]  ;;  %v337_v5 = vld [vmem:[%s807_s23 + $0x8] sm:$0xff]  ;;  %v338_v6 = vld [vmem:[%s807_s23 + $0x10] sm:$0xff] }
   0xf   : > { %v339_v7 = vld [vmem:[%s807_s23 + $0x18] sm:$0xff]  ;;  %447 = vmatpush.msra.mxu1 %v440_v9  ;;  %v340_v12 = vld [vmem:[%s807_s23 + $0x20] sm:$0xff]  ;;  %v436_v14 = vld [vmem:[%s1000_s3 + $0x50] sm:$0xff] }
  0x10   : > { %391 = vmatpush.msra.mxu0 %v345_v2  ;;  %v435_v15 = vld [vmem:[%s1000_s3 + $0x48] sm:$0xff]  ;;  %v434_v16 = vld [vmem:[%s1000_s3 + $0x40] sm:$0xff]  ;;  %v433_v18 = vld [vmem:[%s1000_s3 + $0x38] sm:$0xff] }
  0x11   : > { %448 = vmatpush.msra.mxu1 %v439_v10  ;;  %v341_v17 = vld [vmem:[%s807_s23 + $0x28] sm:$0xff]  ;;  %v432_v19 = vld [vmem:[%s1000_s3 + $0x30] sm:$0xff]  ;;  %v430_v21 = vld [vmem:[%s1000_s3 + $0x20] sm:$0xff] }
  0x12   : > { %392 = vmatpush.msra.mxu0 %v344_v3  ;;  %v431_v20 = vld [vmem:[%s1000_s3 + $0x28] sm:$0xff]  ;;  %v342_v22 = vld [vmem:[%s807_s23 + $0x30] sm:$0xff]  ;;  %v429_v23 = vld [vmem:[%s1000_s3 + $0x18] sm:$0xff] }
  0x13   : > { %699 = vmatmul.msk.f32.vlgmr.msra.gmra.mxu0 %vm352_vm0, %v336_v4  ;;  %449 = vmatpush.msra.mxu1 %v438_v11  ;;  %v343_v24 = vld [vmem:[%s807_s23 + $0x38] sm:$0xff]  ;;  %v428_v25 = vld [vmem:[%s1000_s3 + $0x10] sm:$0xff]  ;;  %v427_v26 = vld [vmem:[%s1000_s3 + $0x8] sm:$0xff]  ;;  %s334_s23 = scalar_lea.vmem %s1006_s9, %s696_s20 }
  0x14   : > { %v426_v27 = vld [vmem:[%s1000_s3] sm:$0xff]  ;;  %v510_v41 = vld [vmem:[%s1002_s5 + $0x78] sm:$0xff]  ;;  %v509_v42 = vld [vmem:[%s1002_s5 + $0x70] sm:$0xff] }
  0x15   : > { %450 = vmatpush.msra.mxu1 %v437_v13  ;;  %v717_v28 = vld [vmem:[%s999_s2] ss:$0 sm:$0xff]  ;;  %515 = vmatpush.msra.mxu2 %v510_v41  ;;  %v508_v43 = vld [vmem:[%s1002_s5 + $0x68] sm:$0xff]  ;;  %v506_v48 = vld [vmem:[%s1002_s5 + $0x58] sm:$0xff] }
  0x16   : > { %v507_v46 = vld [vmem:[%s1002_s5 + $0x60] sm:$0xff]  ;;  %v505_v49 = vld [vmem:[%s1002_s5 + $0x50] sm:$0xff]  ;;  %v504_v50 = vld [vmem:[%s1002_s5 + $0x48] sm:$0xff] }
  0x17   : > { %451 = vmatpush.msra.mxu1 %v436_v14  ;;  %516 = vmatpush.msra.mxu2 %v509_v42  ;;  %v503_v53 = vld [vmem:[%s1002_s5 + $0x40] sm:$0xff]  ;;  %v502_v55 = vld [vmem:[%s1002_s5 + $0x38] sm:$0xff]  ;;  %v501_v56 = vld [vmem:[%s1002_s5 + $0x30] sm:$0xff] }
  0x18   : > { %v500_v57 = vld [vmem:[%s1002_s5 + $0x28] sm:$0xff]  ;;  %v499_v60 = vld [vmem:[%s1002_s5 + $0x20] sm:$0xff]  ;;  %v498_v62 = vld [vmem:[%s1002_s5 + $0x18] sm:$0xff] }
  0x19   : > { %452 = vmatpush.msra.mxu1 %v435_v15  ;;  %517 = vmatpush.msra.mxu2 %v508_v43  ;;  %v497_v2 = vld [vmem:[%s1002_s5 + $0x10] sm:$0xff]  ;;  %v496_v3 = vld [vmem:[%s1002_s5 + $0x8] sm:$0xff]  ;;  %v495_v4 = vld [vmem:[%s1002_s5] sm:$0xff] }
  0x1a   : > { %v566_v43 = vld [vmem:[%s1004_s7 + $0x10] sm:$0xff] }
  0x1b   : > { %700 = vmatmul.msk.f32.gmra.mxu0 %vm352_vm0, %v337_v5  ;;  %453 = vmatpush.msra.mxu1 %v434_v16  ;;  %v718_v5 = vld [vmem:[%s1001_s4] ss:$0 sm:$0xff] }
  0x1c   : > { %518 = vmatpush.msra.mxu2 %v507_v46  ;;  %v719_v46 = vld [vmem:[%s1003_s6] ss:$0 sm:$0xff] }
  0x1d   : > { %454 = vmatpush.msra.mxu1 %v433_v18  ;;  %v579_v18 = vld [vmem:[%s1004_s7 + $0x78] sm:$0xff] }
  0x1e   : > { %519 = vmatpush.msra.mxu2 %v506_v48  ;;  %584 = vmatpush.msra.mxu3 %v579_v18 }
  0x1f   : > { %455 = vmatpush.msra.mxu1 %v432_v19  ;;  %v578_v19 = vld [vmem:[%s1004_s7 + $0x70] sm:$0xff] }
  0x20   : > { %520 = vmatpush.msra.mxu2 %v505_v49  ;;  %585 = vmatpush.msra.mxu3 %v578_v19 }
  0x21   : > { %456 = vmatpush.msra.mxu1 %v431_v20  ;;  %v577_v20 = vld [vmem:[%s1004_s7 + $0x68] sm:$0xff] }
  0x22   : > { %521 = vmatpush.msra.mxu2 %v504_v50  ;;  %586 = vmatpush.msra.mxu3 %v577_v20 }
  0x23   : > { %701 = vmatmul.msk.f32.gmra.mxu0 %vm352_vm0, %v338_v6  ;;  %457 = vmatpush.msra.mxu1 %v430_v21 }
  0x24   : > { %522 = vmatpush.msra.mxu2 %v503_v53 }
  0x25   : > { %458 = vmatpush.msra.mxu1 %v429_v23  ;;  %v576_v23 = vld [vmem:[%s1004_s7 + $0x60] sm:$0xff] }
  0x26   : > { %523 = vmatpush.msra.mxu2 %v502_v55  ;;  %587 = vmatpush.msra.mxu3 %v576_v23 }
  0x27   : > { %459 = vmatpush.msra.mxu1 %v428_v25  ;;  %v575_v25 = vld [vmem:[%s1004_s7 + $0x58] sm:$0xff] }
  0x28   : > { %524 = vmatpush.msra.mxu2 %v501_v56  ;;  %588 = vmatpush.msra.mxu3 %v575_v25 }
  0x29   : > { %460 = vmatpush.msra.mxu1 %v427_v26  ;;  %v574_v26 = vld [vmem:[%s1004_s7 + $0x50] sm:$0xff] }
  0x2a   : > { %525 = vmatpush.msra.mxu2 %v500_v57  ;;  %589 = vmatpush.msra.mxu3 %v574_v26 }
  0x2b   : > { %702 = vmatmul.msk.f32.gmra.mxu0 %vm352_vm0, %v339_v7  ;;  %461 = vmatpush.msra.mxu1 %v426_v27  ;;  %v573_v27 = vld [vmem:[%s1004_s7 + $0x48] sm:$0xff] }
  0x2c   : > { %526 = vmatpush.msra.mxu2 %v499_v60  ;;  %590 = vmatpush.msra.mxu3 %v573_v27 }
  0x2e   : > { %527 = vmatpush.msra.mxu2 %v498_v62 }
  0x30   : > { %528 = vmatpush.msra.mxu2 %v497_v2 }
  0x32   : > { %529 = vmatpush.msra.mxu2 %v496_v3 }
  0x33   : > { %703 = vmatmul.msk.f32.gmra.mxu0 %vm352_vm0, %v340_v12 }
  0x34   : > { %530 = vmatpush.msra.mxu2 %v495_v4 }
  0x3b   : > { %704 = vmatmul.msk.f32.gmra.mxu0 %vm352_vm0, %v341_v17 }
  0x43   : > { %705 = vmatmul.msk.f32.gmra.mxu0 %vm352_vm0, %v342_v22 }
  0x4b   : > { %706 = vmatmul.msk.f32.gmra.mxu0 %vm352_vm0, %v343_v24 }
  0x90   : > { %v394_v29 = vpop.f32.mrf.mxu0 }
  0x91   : > { %v395_v30 = vadd.f32 %v717_v28, %v394_v29 }
  0x93   : > { %v418_v31 = vmax.f32 %v395_v30, 0.0  ;;  %v572_v30 = vld [vmem:[%s1004_s7 + $0x40] sm:$0xff] }
  0x94   : > { %591 = vmatpush.msra.mxu3 %v572_v30 }
  0x95   : > { %462 = vmatmul.f32.vlgmr.msra.gmra.mxu1 %v418_v31 }
  0x98   : > { %v397_v32 = vpop.f32.mrf.mxu0 }
  0x99   : > { %v398_v33 = vadd.f32 %v717_v28, %v397_v32  ;;  %v571_v32 = vld [vmem:[%s1004_s7 + $0x38] sm:$0xff] }
  0x9a   : > { %592 = vmatpush.msra.mxu3 %v571_v32 }
  0x9b   : > { %v419_v34 = vmax.f32 %v398_v33, 0.0  ;;  %v570_v33 = vld [vmem:[%s1004_s7 + $0x30] sm:$0xff] }
  0x9c   : > { %593 = vmatpush.msra.mxu3 %v570_v33 }
  0x9d   : > { %465 = vmatmul.f32.gmra.mxu1 %v419_v34  ;;  %v569_v34 = vld [vmem:[%s1004_s7 + $0x28] sm:$0xff] }
  0x9e   : > { %594 = vmatpush.msra.mxu3 %v569_v34 }
  0xa0   : > { %v400_v35 = vpop.f32.mrf.mxu0 }
  0xa1   : > { %v401_v36 = vadd.f32 %v717_v28, %v400_v35 }
  0xa3   : > { %v420_v37 = vmax.f32 %v401_v36, 0.0 }
  0xa5   : > { %468 = vmatmul.f32.gmra.mxu1 %v420_v37  ;;  %v568_v37 = vld [vmem:[%s1004_s7 + $0x20] sm:$0xff] }
  0xa6   : > { %595 = vmatpush.msra.mxu3 %v568_v37 }
  0xa8   : > { %v403_v38 = vpop.f32.mrf.mxu0 }
  0xa9   : > { %v404_v39 = vadd.f32 %v717_v28, %v403_v38 }
  0xab   : > { %v421_v40 = vmax.f32 %v404_v39, 0.0  ;;  %v567_v39 = vld [vmem:[%s1004_s7 + $0x18] sm:$0xff] }
  0xac   : > { %596 = vmatpush.msra.mxu3 %v567_v39 }
  0xad   : > { %471 = vmatmul.f32.gmra.mxu1 %v421_v40 }
  0xae   : > { %597 = vmatpush.msra.mxu3 %v566_v43 }
  0xb0   : > { %v406_v44 = vpop.f32.mrf.mxu0 }
  0xb1   : > { %v407_v45 = vadd.f32 %v717_v28, %v406_v44  ;;  %v565_v44 = vld [vmem:[%s1004_s7 + $0x8] sm:$0xff] }
  0xb2   : > { %598 = vmatpush.msra.mxu3 %v565_v44 }
  0xb3   : > { %v422_v47 = vmax.f32 %v407_v45, 0.0  ;;  %v564_v45 = vld [vmem:[%s1004_s7] sm:$0xff] }
  0xb4   : > { %599 = vmatpush.msra.mxu3 %v564_v45 }
  0xb5   : > { %474 = vmatmul.f32.gmra.mxu1 %v422_v47 }
  0xb8   : > { %v409_v51 = vpop.f32.mrf.mxu0 }
  0xb9   : > { %v410_v52 = vadd.f32 %v717_v28, %v409_v51 }
  0xbb   : > { %v423_v54 = vmax.f32 %v410_v52, 0.0 }
  0xbd   : > { %477 = vmatmul.f32.gmra.mxu1 %v423_v54 }
  0xc0   : > { %v412_v58 = vpop.f32.mrf.mxu0 }
  0xc1   : > { %v413_v59 = vadd.f32 %v717_v28, %v412_v58 }
  0xc3   : > { %v424_v61 = vmax.f32 %v413_v59, 0.0 }
  0xc5   : > { %480 = vmatmul.f32.gmra.mxu1 %v424_v61 }
  0xc8   : > { %v415_v63 = vpop.f32.mrf.mxu0 }
  0xc9   : > { %v416_v0 = vadd.f32 %v717_v28, %v415_v63 }
  0xcb   : > { %v425_v1 = vmax.f32 %v416_v0, 0.0 }
  0xcd   : > { %483 = vmatmul.f32.gmra.mxu1 %v425_v1 }
 0x112   : > { %v463_v6 = vpop.f32.mrf.mxu1 }
 0x113   : > { %v464_v7 = vadd.f32 %v718_v5, %v463_v6 }
 0x115   : > { %v487_v8 = vmax.f32 %v464_v7, 0.0  ;;  %v720_v7 = vld [vmem:[%s1005_s8] ss:$0 sm:$0xff] }
 0x117   : > { %531 = vmatmul.f32.vlgmr.msra.gmra.mxu2 %v487_v8 }
 0x11a   : > { %v466_v9 = vpop.f32.mrf.mxu1 }
 0x11b   : > { %v467_v10 = vadd.f32 %v718_v5, %v466_v9 }
 0x11d   : > { %v488_v11 = vmax.f32 %v467_v10, 0.0 }
 0x11f   : > { %534 = vmatmul.f32.gmra.mxu2 %v488_v11 }
 0x122   : > { %v469_v12 = vpop.f32.mrf.mxu1 }
 0x123   : > { %v470_v13 = vadd.f32 %v718_v5, %v469_v12 }
 0x125   : > { %v489_v14 = vmax.f32 %v470_v13, 0.0 }
 0x127   : > { %537 = vmatmul.f32.gmra.mxu2 %v489_v14 }
 0x12a   : > { %v472_v15 = vpop.f32.mrf.mxu1 }
 0x12b   : > { %v473_v16 = vadd.f32 %v718_v5, %v472_v15 }
 0x12d   : > { %v490_v17 = vmax.f32 %v473_v16, 0.0 }
 0x12f   : > { %540 = vmatmul.f32.gmra.mxu2 %v490_v17 }
 0x132   : > { %v475_v21 = vpop.f32.mrf.mxu1 }
 0x133   : > { %v476_v22 = vadd.f32 %v718_v5, %v475_v21 }
 0x135   : > { %v491_v24 = vmax.f32 %v476_v22, 0.0 }
 0x137   : > { %543 = vmatmul.f32.gmra.mxu2 %v491_v24 }
 0x13a   : > { %v478_v28 = vpop.f32.mrf.mxu1 }
 0x13b   : > { %v479_v29 = vadd.f32 %v718_v5, %v478_v28 }
 0x13d   : > { %v492_v31 = vmax.f32 %v479_v29, 0.0 }
 0x13f   : > { %546 = vmatmul.f32.gmra.mxu2 %v492_v31 }
 0x142   : > { %v481_v35 = vpop.f32.mrf.mxu1 }
 0x143   : > { %v482_v36 = vadd.f32 %v718_v5, %v481_v35 }
 0x145   : > { %v493_v38 = vmax.f32 %v482_v36, 0.0 }
 0x147   : > { %549 = vmatmul.f32.gmra.mxu2 %v493_v38 }
 0x14a   : > { %v484_v40 = vpop.f32.mrf.mxu1 }
 0x14b   : > { %v485_v41 = vadd.f32 %v718_v5, %v484_v40 }
 0x14d   : > { %v494_v42 = vmax.f32 %v485_v41, 0.0 }
 0x14f   : > { %552 = vmatmul.f32.gmra.mxu2 %v494_v42 }
 0x19a   : > { %v532_v47 = vpop.f32.mrf.mxu2 }
 0x19b   : > { %v533_v48 = vadd.f32 %v719_v46, %v532_v47 }
 0x19d   : > { %v556_v49 = vmax.f32 %v533_v48, 0.0 }
 0x19f   : > { %600 = vmatmul.f32.vlgmr.msra.gmra.mxu3 %v556_v49 }
 0x1a2   : > { %v535_v50 = vpop.f32.mrf.mxu2 }
 0x1a3   : > { %v536_v51 = vadd.f32 %v719_v46, %v535_v50 }
 0x1a5   : > { %v557_v52 = vmax.f32 %v536_v51, 0.0 }
 0x1a7   : > { %603 = vmatmul.f32.gmra.mxu3 %v557_v52 }
 0x1aa   : > { %v538_v53 = vpop.f32.mrf.mxu2 }
 0x1ab   : > { %v539_v54 = vadd.f32 %v719_v46, %v538_v53 }
 0x1ad   : > { %v558_v55 = vmax.f32 %v539_v54, 0.0 }
 0x1af   : > { %606 = vmatmul.f32.gmra.mxu3 %v558_v55 }
 0x1b2   : > { %v541_v56 = vpop.f32.mrf.mxu2 }
 0x1b3   : > { %v542_v57 = vadd.f32 %v719_v46, %v541_v56 }
 0x1b5   : > { %v559_v58 = vmax.f32 %v542_v57, 0.0 }
 0x1b7   : > { %609 = vmatmul.f32.gmra.mxu3 %v559_v58 }
 0x1ba   : > { %v544_v59 = vpop.f32.mrf.mxu2 }
 0x1bb   : > { %v545_v60 = vadd.f32 %v719_v46, %v544_v59 }
 0x1bd   : > { %v560_v61 = vmax.f32 %v545_v60, 0.0 }
 0x1bf   : > { %612 = vmatmul.f32.gmra.mxu3 %v560_v61 }
 0x1c2   : > { %v547_v62 = vpop.f32.mrf.mxu2 }
 0x1c3   : > { %v548_v63 = vadd.f32 %v719_v46, %v547_v62 }
 0x1c5   : > { %v561_v0 = vmax.f32 %v548_v63, 0.0 }
 0x1c7   : > { %615 = vmatmul.f32.gmra.mxu3 %v561_v0 }
 0x1ca   : > { %v550_v1 = vpop.f32.mrf.mxu2 }
 0x1cb   : > { %v551_v2 = vadd.f32 %v719_v46, %v550_v1 }
 0x1cd   : > { %v562_v3 = vmax.f32 %v551_v2, 0.0 }
 0x1cf   : > { %618 = vmatmul.f32.gmra.mxu3 %v562_v3 }
 0x1d2   : > { %v553_v4 = vpop.f32.mrf.mxu2 }
 0x1d3   : > { %v554_v5 = vadd.f32 %v719_v46, %v553_v4 }
 0x1d5   : > { %v563_v6 = vmax.f32 %v554_v5, 0.0 }
 0x1d7   : > { %621 = vmatmul.f32.gmra.mxu3 %v563_v6 }
 0x222   : > { %v601_v8 = vpop.f32.mrf.mxu3 }
 0x223   : > { %v602_v9 = vadd.f32 %v720_v7, %v601_v8 }
 0x225   : > { %626 = vst.msk [vmem:[%s334_s23] sm:$0xff] %vm625_vm1, %v602_v9 }
 0x22a   : > { %v604_v10 = vpop.f32.mrf.mxu3 }
 0x22b   : > { %v605_v11 = vadd.f32 %v720_v7, %v604_v10 }
 0x22d   : > { %627 = vst.msk [vmem:[%s334_s23 + $0x8] sm:$0xff] %vm625_vm1, %v605_v11 }
 0x232   : > { %v607_v12 = vpop.f32.mrf.mxu3 }
 0x233   : > { %v608_v13 = vadd.f32 %v720_v7, %v607_v12 }
 0x235   : > { %628 = vst.msk [vmem:[%s334_s23 + $0x10] sm:$0xff] %vm625_vm1, %v608_v13 }
 0x23a   : > { %v610_v14 = vpop.f32.mrf.mxu3 }
 0x23b   : > { %v611_v15 = vadd.f32 %v720_v7, %v610_v14 }
 0x23d   : > { %629 = vst.msk [vmem:[%s334_s23 + $0x18] sm:$0xff] %vm625_vm1, %v611_v15 }
 0x242   : > { %v613_v16 = vpop.f32.mrf.mxu3 }
 0x243   : > { %v614_v17 = vadd.f32 %v720_v7, %v613_v16 }
 0x245   : > { %630 = vst.msk [vmem:[%s334_s23 + $0x20] sm:$0xff] %vm625_vm1, %v614_v17 }
 0x24a   : > { %v616_v18 = vpop.f32.mrf.mxu3 }
 0x24b   : > { %v617_v19 = vadd.f32 %v720_v7, %v616_v18 }
 0x24d   : > { %631 = vst.msk [vmem:[%s334_s23 + $0x28] sm:$0xff] %vm625_vm1, %v617_v19 }
 0x252   : > { %v619_v20 = vpop.f32.mrf.mxu3 }
 0x253   : > { %v620_v21 = vadd.f32 %v720_v7, %v619_v20 }
 0x255   : > { %632 = vst.msk [vmem:[%s334_s23 + $0x30] sm:$0xff] %vm625_vm1, %v620_v21 }
 0x25a   : > { %v622_v22 = vpop.f32.mrf.mxu3 }
 0x25b   : > { %v623_v23 = vadd.f32 %v720_v7, %v622_v22 }
 0x25d   : > { %633 = vst.msk [vmem:[%s334_s23 + $0x38] sm:$0xff] %vm625_vm1, %v623_v23 }
 0x25e PF: > { %s19_s30 = sadd.s32 1, %s727_s30  }
 0x25f   : > { %p16_p4 = scmp.ge.s32.totalorder %s19_s30, 5  }
 0x261   :  { %18 = sbr.rel (!%p16_p4) target bundleno = 1 (0x1), region = 86 }

</bundles_post_ra>
